<compile_context>
chip_gen: v5e
topology: v5e:2x2
jax: 0.10.0
libtpu: 0.0.40
codegen_flags: <defaults>
</compile_context>

<pallas_src>
import functools

import jax
import jax.numpy as jnp
from jax import lax
from jax.experimental import pallas as pl
from jax.experimental.pallas import tpu as pltpu

VMEM_SPEC = pl.BlockSpec(memory_space=pltpu.MemorySpace.VMEM)
SMEM_SPEC = pl.BlockSpec(memory_space=pltpu.MemorySpace.SMEM)


# ------------------------------ fused kernel ------------------------------- #

def _gnn_fused_kernel(
    # SMEM inputs (indices + scalars)
    src_ref, dst_ref, batch_ref, alpha_ref,
    # VMEM tensor inputs
    x_in_ref, e_in_ref,
    wn_ref, bn_ref, we_ref, be_ref,
    w1_ref, b1_ref, w2_ref, b2_ref,
    ws_ref, bs_ref,
    # output
    out_ref,
    # VMEM scratch (persist across the whole fused forward)
    x_s, e_s, agg_s, pool_s,
    *, depth, num_edges, num_nodes):
  # ---- input projections (lane-dense H outputs, stay resident in VMEM) ----
  x_s[...] = jnp.maximum(
      jnp.dot(x_in_ref[...], wn_ref[...], preferred_element_type=jnp.float32)
      + bn_ref[...], 0.0)                                      # ReLU(node proj)
  e_s[...] = (jnp.dot(e_in_ref[...], we_ref[...],
                      preferred_element_type=jnp.float32) + be_ref[...])

  # ---- depth x GINEConv, fully fused ----
  def layer_body(layer, carry):
    # zero the scatter-add accumulator for this layer
    agg_s[...] = jnp.zeros_like(agg_s)

    # index-driven gather + scatter-add:
    #   msg_e = relu(x[src[e]] + edge_feats[e]);  agg[dst[e]] += msg_e
    def edge_body(e, c):
      s = src_ref[e]
      d = dst_ref[e]
      msg = jnp.maximum(x_s[pl.ds(s, 1), :] + e_s[pl.ds(e, 1), :], 0.0)
      agg_s[pl.ds(d, 1), :] = agg_s[pl.ds(d, 1), :] + msg
      return c
    lax.fori_loop(0, num_edges, edge_body, 0)

    # GINEConv update: nn((1 + eps) * x_i + aggr), eps = 0
    h = x_s[...] + agg_s[...]
    h = jnp.maximum(
        jnp.dot(h, w1_ref[layer], preferred_element_type=jnp.float32)
        + b1_ref[layer], 0.0)
    h = (jnp.dot(h, w2_ref[layer], preferred_element_type=jnp.float32)
         + b2_ref[layer])

    # inter-layer ReLU for all but the last layer (GNN.forward)
    @pl.when(layer < depth - 1)
    def _():
      x_s[...] = jnp.maximum(h, 0.0)

    @pl.when(layer == depth - 1)
    def _():
      x_s[...] = h

    # TODO(synk): dropout is identity here (eval mode); training-mode dropout
    # would use pltpu.prng_seed / pltpu.prng_random_bits.
    return carry

  lax.fori_loop(0, depth, layer_body, 0)

  # ---- global_add_pool: index-driven scatter-add into (B, H) scratch ----
  pool_s[...] = jnp.zeros_like(pool_s)

  def pool_body(n, c):
    g = batch_ref[n]
    pool_s[pl.ds(g, 1), :] = pool_s[pl.ds(g, 1), :] + x_s[pl.ds(n, 1), :]
    return c
  lax.fori_loop(0, num_nodes, pool_body, 0)

  # ---- sparsify: Linear + PReLU (alpha scalar read from SMEM) ----
  y = (jnp.dot(pool_s[...], ws_ref[...], preferred_element_type=jnp.float32)
       + bs_ref[...])
  alpha = alpha_ref[0]
  out_ref[...] = jnp.where(y > 0.0, y, alpha * y)


# ------------------------------ model wrapper ------------------------------ #

def init_params(key, node_in, edge_in, hidden, readout_feats, depth):
  """PyTorch nn.Linear-style init: U(-1/sqrt(fan_in), 1/sqrt(fan_in))."""
  def lin(k, fan_in, fan_out):
    k1, k2 = jax.random.split(k)
    lim = 1.0 / jnp.sqrt(fan_in)
    w = jax.random.uniform(k1, (fan_in, fan_out), jnp.float32, -lim, lim)
    b = jax.random.uniform(k2, (fan_out,), jnp.float32, -lim, lim)
    return w, b

  keys = jax.random.split(key, 3 + 2 * depth)
  params = {}
  params["node_proj"] = lin(keys[0], node_in, hidden)
  params["edge_proj"] = lin(keys[1], edge_in, hidden)
  params["gnn"] = []
  for i in range(depth):
    w1, b1 = lin(keys[2 + 2 * i], hidden, hidden)
    w2, b2 = lin(keys[3 + 2 * i], hidden, hidden)
    params["gnn"].append((w1, b1, w2, b2))
  params["sparsify"] = lin(keys[2 + 2 * depth], hidden, readout_feats)
  params["prelu_alpha"] = jnp.array(0.25, jnp.float32)   # PReLU default init
  return params


def gnn_forward(params, node_x, edge_attr, edge_index, batch, num_graphs,
                depth):
  num_nodes = node_x.shape[0]
  num_edges = edge_attr.shape[0]
  hidden = params["node_proj"][0].shape[1]
  readout = params["sparsify"][0].shape[1]

  src = edge_index[0].astype(jnp.int32)
  dst = edge_index[1].astype(jnp.int32)
  batch = batch.astype(jnp.int32)

  wn, bn = params["node_proj"]
  we, be = params["edge_proj"]
  # stacked per-layer weights: one VMEM-resident (depth, H, H) operand each
  w1s = jnp.stack([l[0] for l in params["gnn"]])               # (D, H, H)
  b1s = jnp.stack([l[1] for l in params["gnn"]])[:, None, :]   # (D, 1, H)
  w2s = jnp.stack([l[2] for l in params["gnn"]])               # (D, H, H)
  b2s = jnp.stack([l[3] for l in params["gnn"]])[:, None, :]   # (D, 1, H)
  ws, bs = params["sparsify"]
  alpha = params["prelu_alpha"].reshape(1)

  kernel = functools.partial(
      _gnn_fused_kernel, depth=depth, num_edges=num_edges,
      num_nodes=num_nodes)

  return pl.pallas_call(
      kernel,
      out_shape=jax.ShapeDtypeStruct((num_graphs, readout), jnp.float32),
      in_specs=[SMEM_SPEC] * 4 + [VMEM_SPEC] * 12,
      out_specs=VMEM_SPEC,
      scratch_shapes=[
          pltpu.VMEM((num_nodes, hidden), jnp.float32),   # node feats
          pltpu.VMEM((num_edges, hidden), jnp.float32),   # edge feats
          pltpu.VMEM((num_nodes, hidden), jnp.float32),   # scatter-add accum
          pltpu.VMEM((num_graphs, hidden), jnp.float32),  # pooled feats
      ],
      # NOTE: for larger graphs, tile nodes/edges with a grid (parallel node
      # axis for v7x's 2 TCs) and raise vmem_limit_bytes; at these sizes the
      # default scoped VMEM is ample on every TPU generation.
  )(src, dst, batch, alpha,
    node_x, edge_attr,
    wn, bn.reshape(1, -1), we, be.reshape(1, -1),
    w1s, b1s, w2s, b2s,
    ws, bs.reshape(1, -1))


# --------------------------- pure-JAX reference ----------------------------- #

def gnn_reference(params, node_x, edge_attr, edge_index, batch, num_graphs,
                  depth):
  src, dst = edge_index[0], edge_index[1]
  wn, bn = params["node_proj"]
  we, be = params["edge_proj"]
  h = jax.nn.relu(node_x @ wn + bn)
  e = edge_attr @ we + be
  for i in range(depth):
    w1, b1, w2, b2 = params["gnn"][i]
    msg = jax.nn.relu(h[src] + e)
    agg = jax.ops.segment_sum(msg, dst, num_segments=h.shape[0])
    hh = h + agg
    hh = jax.nn.relu(hh @ w1 + b1)
    hh = hh @ w2 + b2
    if i < depth - 1:
      hh = jax.nn.relu(hh)
    h = hh
  pooled = jax.ops.segment_sum(h, batch, num_segments=num_graphs)
  y = pooled @ params["sparsify"][0] + params["sparsify"][1]
  return jnp.where(y > 0, y, params["prelu_alpha"] * y)


# ----------------------------------- main ----------------------------------- #

if __name__ == "__main__":
  # small shapes consistent with the module; hidden/readout chosen lane-dense
  NUM_NODES = 24
  NUM_EDGES = 48
  NODE_IN = 16
  EDGE_IN = 8
  HIDDEN = 128      # node_hid_feats (lane-dense)
  READOUT = 128     # readout_feats  (lane-dense)
  DEPTH = 5
  NUM_GRAPHS = 2

  key = jax.random.PRNGKey(0)
  k_x, k_e, k_src, k_dst, k_p = jax.random.split(key, 5)

  node_x = jax.random.normal(k_x, (NUM_NODES, NODE_IN), jnp.float32)
  edge_attr = jax.random.normal(k_e, (NUM_EDGES, EDGE_IN), jnp.float32)
  src = jax.random.randint(k_src, (NUM_EDGES,), 0, NUM_NODES, jnp.int32)
  dst = jax.random.randint(k_dst, (NUM_EDGES,), 0, NUM_NODES, jnp.int32)
  edge_index = jnp.stack([src, dst], axis=0)                      # (2, E)
  batch = jnp.concatenate([jnp.zeros(NUM_NODES // 2, jnp.int32),
                           jnp.ones(NUM_NODES - NUM_NODES // 2, jnp.int32)])

  params = init_params(k_p, NODE_IN, EDGE_IN, HIDDEN, READOUT, DEPTH)

  out = gnn_forward(params, node_x, edge_attr, edge_index, batch,
                    NUM_GRAPHS, DEPTH)
  out = jax.block_until_ready(out)

  ref = gnn_reference(params, node_x, edge_attr, edge_index, batch,
                      NUM_GRAPHS, DEPTH)
  assert out.shape == (NUM_GRAPHS, READOUT)
  assert jnp.allclose(out, ref, atol=5e-3, rtol=5e-3), "mismatch vs reference"

  print("KERNEL_OK")
</pallas_src>

<mosaic_0001>
module attributes {stable_mosaic.version = 11 : i64} {
  func.func @_gnn_fused_kernel(%arg0: memref<48xi32, #tpu.memory_space<smem>>, %arg1: memref<48xi32, #tpu.memory_space<smem>>, %arg2: memref<24xi32, #tpu.memory_space<smem>>, %arg3: memref<1xf32, #tpu.memory_space<smem>>, %arg4: memref<24x16xf32, #tpu.memory_space<vmem>>, %arg5: memref<48x8xf32, #tpu.memory_space<vmem>>, %arg6: memref<16x128xf32, #tpu.memory_space<vmem>>, %arg7: memref<1x128xf32, #tpu.memory_space<vmem>>, %arg8: memref<8x128xf32, #tpu.memory_space<vmem>>, %arg9: memref<1x128xf32, #tpu.memory_space<vmem>>, %arg10: memref<5x128x128xf32, #tpu.memory_space<vmem>>, %arg11: memref<5x1x128xf32, #tpu.memory_space<vmem>>, %arg12: memref<5x128x128xf32, #tpu.memory_space<vmem>>, %arg13: memref<5x1x128xf32, #tpu.memory_space<vmem>>, %arg14: memref<128x128xf32, #tpu.memory_space<vmem>>, %arg15: memref<1x128xf32, #tpu.memory_space<vmem>>, %arg16: memref<2x128xf32, #tpu.memory_space<vmem>>, %arg17: memref<24x128xf32, #tpu.memory_space<vmem>>, %arg18: memref<48x128xf32, #tpu.memory_space<vmem>>, %arg19: memref<24x128xf32, #tpu.memory_space<vmem>>, %arg20: memref<2x128xf32, #tpu.memory_space<vmem>>) attributes {dimension_semantics = [], scalar_prefetch = 0 : i64, scratch_operands = 4 : i64, tpu.core_type = #tpu.core_type<tc>} {
    %c0 = arith.constant 0 : index
    %c0_0 = arith.constant 0 : index
    %0 = vector.load %arg4[%c0, %c0_0] : memref<24x16xf32, #tpu.memory_space<vmem>>, vector<24x16xf32>
    %c0_1 = arith.constant 0 : index
    %c0_2 = arith.constant 0 : index
    %1 = vector.load %arg6[%c0_1, %c0_2] : memref<16x128xf32, #tpu.memory_space<vmem>>, vector<16x128xf32>
    %cst = arith.constant dense<0.000000e+00> : vector<24x128xf32>
    %2 = tpu.matmul %0, %1, %cst {dimension_numbers = #tpu.dot_dimension_numbers<[1], [0], [0], [1], [0, 0, 1, 1], [], []>} : vector<24x16xf32>, vector<16x128xf32>, vector<24x128xf32> -> vector<24x128xf32>
    %c0_3 = arith.constant 0 : index
    %c0_4 = arith.constant 0 : index
    %3 = vector.load %arg7[%c0_3, %c0_4] : memref<1x128xf32, #tpu.memory_space<vmem>>, vector<1x128xf32>
    %4 = vector.broadcast %3 : vector<1x128xf32> to vector<24x128xf32>
    %5 = arith.addf %2, %4 : vector<24x128xf32>
    %cst_5 = arith.constant 0.000000e+00 : f32
    %6 = vector.broadcast %cst_5 : f32 to vector<24x128xf32>
    %7 = arith.maximumf %5, %6 : vector<24x128xf32>
    %c0_6 = arith.constant 0 : index
    %c0_7 = arith.constant 0 : index
    %8 = vector.load %arg17[%c0_6, %c0_7] : memref<24x128xf32, #tpu.memory_space<vmem>>, vector<24x128xf32>
    tpu.vector_store %arg17[%c0_6, %c0_7], %7 {strides = array<i32>} : memref<24x128xf32, #tpu.memory_space<vmem>>, vector<24x128xf32>,
    %c0_8 = arith.constant 0 : index
    %c0_9 = arith.constant 0 : index
    %9 = vector.load %arg5[%c0_8, %c0_9] : memref<48x8xf32, #tpu.memory_space<vmem>>, vector<48x8xf32>
    %c0_10 = arith.constant 0 : index
    %c0_11 = arith.constant 0 : index
    %10 = vector.load %arg8[%c0_10, %c0_11] : memref<8x128xf32, #tpu.memory_space<vmem>>, vector<8x128xf32>
    %cst_12 = arith.constant dense<0.000000e+00> : vector<48x128xf32>
    %11 = tpu.matmul %9, %10, %cst_12 {dimension_numbers = #tpu.dot_dimension_numbers<[1], [0], [0], [1], [0, 0, 1, 1], [], []>} : vector<48x8xf32>, vector<8x128xf32>, vector<48x128xf32> -> vector<48x128xf32>
    %c0_13 = arith.constant 0 : index
    %c0_14 = arith.constant 0 : index
    %12 = vector.load %arg9[%c0_13, %c0_14] : memref<1x128xf32, #tpu.memory_space<vmem>>, vector<1x128xf32>
    %13 = vector.broadcast %12 : vector<1x128xf32> to vector<48x128xf32>
    %14 = arith.addf %11, %13 : vector<48x128xf32>
    %c0_15 = arith.constant 0 : index
    %c0_16 = arith.constant 0 : index
    %15 = vector.load %arg18[%c0_15, %c0_16] : memref<48x128xf32, #tpu.memory_space<vmem>>, vector<48x128xf32>
    tpu.vector_store %arg18[%c0_15, %c0_16], %14 {strides = array<i32>} : memref<48x128xf32, #tpu.memory_space<vmem>>, vector<48x128xf32>,
    %c0_i32 = arith.constant 0 : i32
    %c5_i32 = arith.constant 5 : i32
    %16 = arith.addi %c0_i32, %c5_i32 : i32
    %c1_i32 = arith.constant 1 : i32
    scf.for %arg21 = %c0_i32 to %16 step %c1_i32  : i32 {
      %cst_35 = arith.constant 0.000000e+00 : f32
      %33 = vector.broadcast %cst_35 : f32 to vector<24x128xf32>
      %c0_36 = arith.constant 0 : index
      %c0_37 = arith.constant 0 : index
      %34 = vector.load %arg19[%c0_36, %c0_37] : memref<24x128xf32, #tpu.memory_space<vmem>>, vector<24x128xf32>
      tpu.vector_store %arg19[%c0_36, %c0_37], %33 {strides = array<i32>} : memref<24x128xf32, #tpu.memory_space<vmem>>, vector<24x128xf32>,
      %c0_i32_38 = arith.constant 0 : i32
      %c48_i32 = arith.constant 48 : i32
      %35 = arith.addi %c0_i32_38, %c48_i32 : i32
      %c1_i32_39 = arith.constant 1 : i32
      scf.for %arg22 = %c0_i32_38 to %35 step %c1_i32_39  : i32 {
        %65 = arith.index_cast %arg22 : i32 to index
        %66 = memref.load %arg0[%65] : memref<48xi32, #tpu.memory_space<smem>>
        %67 = arith.index_cast %arg22 : i32 to index
        %68 = memref.load %arg1[%67] : memref<48xi32, #tpu.memory_space<smem>>
        %69 = arith.index_cast %66 : i32 to index
        %c0_59 = arith.constant 0 : index
        %70 = vector.load %arg17[%69, %c0_59] : memref<24x128xf32, #tpu.memory_space<vmem>>, vector<1x128xf32>
        %71 = arith.index_cast %arg22 : i32 to index
        %c0_60 = arith.constant 0 : index
        %72 = vector.load %arg18[%71, %c0_60] : memref<48x128xf32, #tpu.memory_space<vmem>>, vector<1x128xf32>
        %73 = arith.addf %70, %72 : vector<1x128xf32>
        %cst_61 = arith.constant 0.000000e+00 : f32
        %74 = vector.broadcast %cst_61 : f32 to vector<1x128xf32>
        %75 = arith.maximumf %73, %74 : vector<1x128xf32>
        %76 = arith.index_cast %68 : i32 to index
        %c0_62 = arith.constant 0 : index
        %77 = vector.load %arg19[%76, %c0_62] : memref<24x128xf32, #tpu.memory_space<vmem>>, vector<1x128xf32>
        %78 = arith.addf %77, %75 : vector<1x128xf32>
        %79 = arith.index_cast %68 : i32 to index
        %c0_63 = arith.constant 0 : index
        %80 = vector.load %arg19[%79, %c0_63] : memref<24x128xf32, #tpu.memory_space<vmem>>, vector<1x128xf32>
        tpu.vector_store %arg19[%79, %c0_63], %78 {strides = array<i32>} : memref<24x128xf32, #tpu.memory_space<vmem>>, vector<1x128xf32>,
      }
      %c48_i32_40 = arith.constant 48 : i32
      %c0_41 = arith.constant 0 : index
      %c0_42 = arith.constant 0 : index
      %36 = vector.load %arg17[%c0_41, %c0_42] : memref<24x128xf32, #tpu.memory_space<vmem>>, vector<24x128xf32>
      %c0_43 = arith.constant 0 : index
      %c0_44 = arith.constant 0 : index
      %37 = vector.load %arg19[%c0_43, %c0_44] : memref<24x128xf32, #tpu.memory_space<vmem>>, vector<24x128xf32>
      %38 = arith.addf %36, %37 : vector<24x128xf32>
      %39 = arith.index_cast %arg21 : i32 to index
      %c0_45 = arith.constant 0 : index
      %c0_46 = arith.constant 0 : index
      %40 = vector.load %arg10[%39, %c0_45, %c0_46] : memref<5x128x128xf32, #tpu.memory_space<vmem>>, vector<1x128x128xf32>
      %41 = vector.shape_cast %40 : vector<1x128x128xf32> to vector<128x128xf32>
      %cst_47 = arith.constant dense<0.000000e+00> : vector<24x128xf32>
      %42 = tpu.matmul %38, %41, %cst_47 {dimension_numbers = #tpu.dot_dimension_numbers<[1], [0], [0], [1], [0, 0, 1, 1], [], []>} : vector<24x128xf32>, vector<128x128xf32>, vector<24x128xf32> -> vector<24x128xf32>
      %43 = arith.index_cast %arg21 : i32 to index
      %c0_48 = arith.constant 0 : index
      %c0_49 = arith.constant 0 : index
      %44 = vector.load %arg11[%43, %c0_48, %c0_49] : memref<5x1x128xf32, #tpu.memory_space<vmem>>, vector<1x1x128xf32>
      %45 = vector.shape_cast %44 : vector<1x1x128xf32> to vector<1x128xf32>
      %46 = vector.broadcast %45 : vector<1x128xf32> to vector<24x128xf32>
      %47 = arith.addf %42, %46 : vector<24x128xf32>
      %cst_50 = arith.constant 0.000000e+00 : f32
      %48 = vector.broadcast %cst_50 : f32 to vector<24x128xf32>
      %49 = arith.maximumf %47, %48 : vector<24x128xf32>
      %50 = arith.index_cast %arg21 : i32 to index
      %c0_51 = arith.constant 0 : index
      %c0_52 = arith.constant 0 : index
      %51 = vector.load %arg12[%50, %c0_51, %c0_52] : memref<5x128x128xf32, #tpu.memory_space<vmem>>, vector<1x128x128xf32>
      %52 = vector.shape_cast %51 : vector<1x128x128xf32> to vector<128x128xf32>
      %cst_53 = arith.constant dense<0.000000e+00> : vector<24x128xf32>
      %53 = tpu.matmul %49, %52, %cst_53 {dimension_numbers = #tpu.dot_dimension_numbers<[1], [0], [0], [1], [0, 0, 1, 1], [], []>} : vector<24x128xf32>, vector<128x128xf32>, vector<24x128xf32> -> vector<24x128xf32>
      %54 = arith.index_cast %arg21 : i32 to index
      %c0_54 = arith.constant 0 : index
      %c0_55 = arith.constant 0 : index
      %55 = vector.load %arg13[%54, %c0_54, %c0_55] : memref<5x1x128xf32, #tpu.memory_space<vmem>>, vector<1x1x128xf32>
      %56 = vector.shape_cast %55 : vector<1x1x128xf32> to vector<1x128xf32>
      %57 = vector.broadcast %56 : vector<1x128xf32> to vector<24x128xf32>
      %58 = arith.addf %53, %57 : vector<24x128xf32>
      %c4_i32 = arith.constant 4 : i32
      %59 = arith.cmpi slt, %arg21, %c4_i32 : i32
      %60 = arith.extui %59 : i1 to i32
      %c0_i32_56 = arith.constant 0 : i32
      %61 = arith.cmpi ne, %60, %c0_i32_56 : i32
      scf.if %61 {
        %cst_59 = arith.constant 0.000000e+00 : f32
        %65 = vector.broadcast %cst_59 : f32 to vector<24x128xf32>
        %66 = arith.maximumf %58, %65 : vector<24x128xf32>
        %c0_60 = arith.constant 0 : index
        %c0_61 = arith.constant 0 : index
        %67 = vector.load %arg17[%c0_60, %c0_61] : memref<24x128xf32, #tpu.memory_space<vmem>>, vector<24x128xf32>
        tpu.vector_store %arg17[%c0_60, %c0_61], %66 {strides = array<i32>} : memref<24x128xf32, #tpu.memory_space<vmem>>, vector<24x128xf32>,
      } else {
      }
      %c4_i32_57 = arith.constant 4 : i32
      %62 = arith.cmpi eq, %arg21, %c4_i32_57 : i32
      %63 = arith.extui %62 : i1 to i32
      %c0_i32_58 = arith.constant 0 : i32
      %64 = arith.cmpi ne, %63, %c0_i32_58 : i32
      scf.if %64 {
        %c0_59 = arith.constant 0 : index
        %c0_60 = arith.constant 0 : index
        %65 = vector.load %arg17[%c0_59, %c0_60] : memref<24x128xf32, #tpu.memory_space<vmem>>, vector<24x128xf32>
        tpu.vector_store %arg17[%c0_59, %c0_60], %58 {strides = array<i32>} : memref<24x128xf32, #tpu.memory_space<vmem>>, vector<24x128xf32>,
      } else {
      }
    }
    %c5_i32_17 = arith.constant 5 : i32
    %cst_18 = arith.constant 0.000000e+00 : f32
    %17 = vector.broadcast %cst_18 : f32 to vector<2x128xf32>
    %c0_19 = arith.constant 0 : index
    %c0_20 = arith.constant 0 : index
    %18 = vector.load %arg20[%c0_19, %c0_20] : memref<2x128xf32, #tpu.memory_space<vmem>>, vector<2x128xf32>
    tpu.vector_store %arg20[%c0_19, %c0_20], %17 {strides = array<i32>} : memref<2x128xf32, #tpu.memory_space<vmem>>, vector<2x128xf32>,
    %c0_i32_21 = arith.constant 0 : i32
    %c24_i32 = arith.constant 24 : i32
    %19 = arith.addi %c0_i32_21, %c24_i32 : i32
    %c1_i32_22 = arith.constant 1 : i32
    scf.for %arg21 = %c0_i32_21 to %19 step %c1_i32_22  : i32 {
      %33 = arith.index_cast %arg21 : i32 to index
      %34 = memref.load %arg2[%33] : memref<24xi32, #tpu.memory_space<smem>>
      %35 = arith.index_cast %34 : i32 to index
      %c0_35 = arith.constant 0 : index
      %36 = vector.load %arg20[%35, %c0_35] : memref<2x128xf32, #tpu.memory_space<vmem>>, vector<1x128xf32>
      %37 = arith.index_cast %arg21 : i32 to index
      %c0_36 = arith.constant 0 : index
      %38 = vector.load %arg17[%37, %c0_36] : memref<24x128xf32, #tpu.memory_space<vmem>>, vector<1x128xf32>
      %39 = arith.addf %36, %38 : vector<1x128xf32>
      %40 = arith.index_cast %34 : i32 to index
      %c0_37 = arith.constant 0 : index
      %41 = vector.load %arg20[%40, %c0_37] : memref<2x128xf32, #tpu.memory_space<vmem>>, vector<1x128xf32>
      tpu.vector_store %arg20[%40, %c0_37], %39 {strides = array<i32>} : memref<2x128xf32, #tpu.memory_space<vmem>>, vector<1x128xf32>,
    }
    %c24_i32_23 = arith.constant 24 : i32
    %c0_24 = arith.constant 0 : index
    %c0_25 = arith.constant 0 : index
    %20 = vector.load %arg20[%c0_24, %c0_25] : memref<2x128xf32, #tpu.memory_space<vmem>>, vector<2x128xf32>
    %c0_26 = arith.constant 0 : index
    %c0_27 = arith.constant 0 : index
    %21 = vector.load %arg14[%c0_26, %c0_27] : memref<128x128xf32, #tpu.memory_space<vmem>>, vector<128x128xf32>
    %cst_28 = arith.constant dense<0.000000e+00> : vector<2x128xf32>
    %22 = tpu.matmul %20, %21, %cst_28 {dimension_numbers = #tpu.dot_dimension_numbers<[1], [0], [0], [1], [0, 0, 1, 1], [], []>} : vector<2x128xf32>, vector<128x128xf32>, vector<2x128xf32> -> vector<2x128xf32>
    %c0_29 = arith.constant 0 : index
    %c0_30 = arith.constant 0 : index
    %23 = vector.load %arg15[%c0_29, %c0_30] : memref<1x128xf32, #tpu.memory_space<vmem>>, vector<1x128xf32>
    %24 = vector.broadcast %23 : vector<1x128xf32> to vector<2x128xf32>
    %25 = arith.addf %22, %24 : vector<2x128xf32>
    %c0_31 = arith.constant 0 : index
    %26 = memref.load %arg3[%c0_31] : memref<1xf32, #tpu.memory_space<smem>>
    %cst_32 = arith.constant 0.000000e+00 : f32
    %27 = vector.broadcast %cst_32 : f32 to vector<2x128xf32>
    %28 = arith.cmpf ogt, %25, %27 : vector<2x128xf32>
    %29 = vector.broadcast %26 : f32 to vector<2x128xf32>
    %30 = arith.mulf %29, %25 : vector<2x128xf32>
    %31 = arith.select %28, %25, %30 : vector<2x128xi1>, vector<2x128xf32>
    %c0_33 = arith.constant 0 : index
    %c0_34 = arith.constant 0 : index
    %32 = vector.load %arg16[%c0_33, %c0_34] : memref<2x128xf32, #tpu.memory_space<vmem>>, vector<2x128xf32>
    tpu.vector_store %arg16[%c0_33, %c0_34], %31 {strides = array<i32>} : memref<2x128xf32, #tpu.memory_space<vmem>>, vector<2x128xf32>,
    return
  }
}

</mosaic_0001>

<bundles_post_ra>
// kernel: tpu_custom_call.1
= control target key start
LH: loop header
LB: loop body
LE: loop exit
PB: predicated region body
PF: predicated region fallthrough
CT: control target
= control target key end

     0   :  { %s1007_s0 = inlined_call_operand.vmem [shape: s32[48], index: 0, kind: input, shape index: {}]   ;;  %s1008_s1 = inlined_call_operand.vmem [shape: s32[48], index: 1, kind: input, shape index: {}]   ;;  %s1009_s2 = inlined_call_operand.vmem [shape: s32[24], index: 2, kind: input, shape index: {}]   ;;  %s1010_s3 = inlined_call_operand.<no memory space> [shape: f32[1], index: 3, kind: input, shape index: {}]   ;;  %s1011_s4 = inlined_call_operand.vmem [shape: f32[24,16], index: 4, kind: input, shape index: {}]   ;;  %s1012_s5 = inlined_call_operand.vmem [shape: f32[48,8], index: 5, kind: input, shape index: {}]   ;;  %s1013_s6 = inlined_call_operand.vmem [shape: f32[16,128], index: 6, kind: input, shape index: {}]   ;;  %s1014_s7 = inlined_call_operand.vmem [shape: f32[1,128], index: 7, kind: input, shape index: {}]   ;;  %s1015_s8 = inlined_call_operand.vmem [shape: f32[8,128], index: 8, kind: input, shape index: {}]   ;;  %s1016_s9 = inlined_call_operand.vmem [shape: f32[1,128], index: 9, kind: input, shape index: {}]   ;;  %s1017_s10 = inlined_call_operand.hbm [shape: f32[5,128,128], index: 10, kind: input, shape index: {}]   ;;  %s1018_s11 = inlined_call_operand.vmem [shape: f32[5,1,128], index: 11, kind: input, shape index: {}]   ;;  %s1019_s12 = inlined_call_operand.hbm [shape: f32[5,128,128], index: 12, kind: input, shape index: {}]   ;;  %s1020_s13 = inlined_call_operand.vmem [shape: f32[5,1,128], index: 13, kind: input, shape index: {}]   ;;  %s1021_s14 = inlined_call_operand.hbm [shape: f32[128,128], index: 14, kind: input, shape index: {}]   ;;  %s1022_s15 = inlined_call_operand.vmem [shape: f32[1,128], index: 15, kind: input, shape index: {}]   ;;  %s1023_s16 = inlined_call_operand.hbm [shape: f32[2,128], index: 16, kind: output, shape index: {}]  }
   0x1   :  { %1024 = sst [smem:[#allocation24_spill]] %s1007_s0 }
   0x2   :  { %21 = sst [smem:[#allocation6]] %s1010_s3 }
   0x3   :  { %22 = vsyncpa [#allocation10], 0 }
   0x4   :  { %23 = vsyncpa [#allocation12], 0 }
   0x5   :  { %24 = vsyncpa [#allocation8], 0 }
   0x6   :  { %25 = vsyncpa [#allocation16], 0  ;;  %s41_s25 = sshll.u32 %s1008_s1, 4  ;;  %s42_s25 = int_to_ptr.vmem [resolvable:$true] %s41_s25 }
   0x7   :  { %26 = vsyncpa [#allocation9], 0  ;;  %s773_s26 = smov [#allocation11]   ;;  %s87_s29 = sshll.u32 %s1019_s12, 4  ;;  %s88_s29 = int_to_ptr.hbm [resolvable:$true] %s87_s29 }
   0x8   :  { %44 = dma.vmem_to_smem %s42_s25, 16, %s773_s26, [#allocation12]  }
   0x9   :  { %s774_s30 = smov [#allocation15]   ;;  %s1025_s18 = sld [smem:[#allocation24_spill]] }
   0xa   :  { %s89_s0 = sshll.u32 %s774_s30, 4  ;;  %s775_s20 = smov 128   ;;  %s90_s0 = int_to_ptr.vmem [resolvable:$true] %s89_s0 }
   0xb   :  { %s776_s21 = smov 8   ;;  %s50_s23 = sshll.u32 %s1009_s2, 4  ;;  %s51_s23 = int_to_ptr.vmem [resolvable:$true] %s50_s23 }
   0xc   :  { %95 = dma.hbm_to_vmem [thread:$0]  %s88_s29, 10240, %s90_s0, [#allocation16], %s775_s20, %s775_s20, %s776_s21  }
   0xd   :  { %s777_s24 = smov [#allocation7]   ;;  %s778_s12 = smov [#allocation13]  }
   0xe   :  { %53 = dma.vmem_to_smem %s51_s23, 16, %s778_s12, [#allocation12]  }
   0xf   :  { %s32_s19 = sshll.u32 %s1025_s18, 4  ;;  %s72_s27 = sshll.u32 %s1017_s10, 4  ;;  %s33_s19 = int_to_ptr.vmem [resolvable:$true] %s32_s19  ;;  %s73_s27 = int_to_ptr.hbm [resolvable:$true] %s72_s27 }
  0x10   :  { %35 = dma.vmem_to_smem %s33_s19, 16, %s777_s24, [#allocation10]  }
  0x11   :  { %s779_s28 = smov [#allocation14]   ;;  %s102_s29 = sshll.u32 %s1021_s14, 4  ;;  %s103_s29 = int_to_ptr.hbm [resolvable:$true] %s102_s29 }
  0x12   :  { %s74_s30 = sshll.u32 %s779_s28, 4  ;;  %s780_s2 = smov [#allocation17]   ;;  %s75_s30 = int_to_ptr.vmem [resolvable:$true] %s74_s30 }
  0x13   :  { %80 = dma.hbm_to_vmem [thread:$0]  %s73_s27, 10240, %s75_s30, [#allocation8], %s775_s20, %s775_s20, %s776_s21  }
  0x14   :  { %s104_s0 = sshll.u32 %s780_s2, 4  ;;  %s105_s0 = int_to_ptr.vmem [resolvable:$true] %s104_s0 }
  0x15   :  { %110 = dma.hbm_to_vmem [thread:$0]  %s103_s29, 2048, %s105_s0, [#allocation16], %s775_s20, %s775_s20, %s776_s21  }
  0x16   :  { %751 = dma.done.wait [#allocation10], 16  }
  0x17   :  { %752 = vsyncadd [#allocation10], 4294967280 }
  0x18   :  { %753 = dma.done.wait [#allocation12], 32  }
  0x19   :  { %754 = vsyncadd [#allocation12], 4294967264 }
  0x1a   :  { %755 = dma.done.wait [#allocation8], 10240  }
  0x1b   :  { %756 = vsyncadd [#allocation8], 4294957056 }
  0x1c   :  { %757 = dma.done.wait [#allocation16], 12288  }
  0x1d   :  { %758 = vsyncadd [#allocation16], 4294955008 }
  0x1e   :  { %137 = sfence }
  0x1f   :  { %v195_v0 = vld [vmem:[%s1015_s8] sm:$0xff]  ;;  %v192_v1 = vld [vmem:[%s1012_s5 + $0x18] sm:$0xff]  ;;  %vm200_vm0 = vcmask 64512   ;;  %v142_v2 = vld [vmem:[%s1013_s6 + $0x8] sm:$0xff]  ;;  %vm147_vm1 = vcmask 130048  }
  0x20   :  { %534 = vmatpush.msra.mxu2 %v195_v0  ;;  %532 = vmatpush.msra.mxu3 %v142_v2  ;;  %v141_v3 = vld [vmem:[%s1013_s6] sm:$0xff]  ;;  %v139_v4 = vld [vmem:[%s1011_s4 + $0x8] sm:$0xff]  ;;  %v140_v9 = vld [vmem:[%s1011_s4 + $0x10] sm:$0xff] }
  0x21   :  { %v189_v5 = vld [vmem:[%s1012_s5] sm:$0xff]  ;;  %526 = vmatmul.msk.f32.vlgmr.msra.gmra.mxu2 %vm200_vm0, %v192_v1  ;;  %234 = vmatpush.msra.mxu1 %v195_v0  ;;  %v190_v8 = vld [vmem:[%s1012_s5 + $0x8] sm:$0xff]  ;;  %v191_v11 = vld [vmem:[%s1012_s5 + $0x10] sm:$0xff] }
  0x22   :  { %533 = vmatpush.msra.mxu3 %v141_v3  ;;  %523 = vmatmul.msk.f32.vlgmr.msra.gmra.mxu1 %vm200_vm0, %v189_v5  ;;  %v138_v6 = vld [vmem:[%s1011_s4] sm:$0xff]  ;;  %v194_v10 = vld [vmem:[%s1012_s5 + $0x28] sm:$0xff] }
  0x23   :  { %521 = vmatmul.msk.f32.vlgmr.msra.gmra.mxu3 %vm147_vm1, %v139_v4  ;;  %171 = vmatpush.msra.mxu0 %v142_v2  ;;  %v193_v7 = vld [vmem:[%s1012_s5 + $0x20] sm:$0xff]  ;;  %s941_s5 = smov 0  }
  0x24   :  { %v602_v12 = vld [vmem:[%s1016_s9] ss:$0 sm:$0xff] }
  0x25   :  { %172 = vmatpush.msra.mxu0 %v141_v3  ;;  %v603_v15 = vld [vmem:[%s1014_s7] ss:$0 sm:$0xff] }
  0x26   :  { %520 = vmatmul.msk.f32.vlgmr.msra.gmra.mxu0 %vm147_vm1, %v138_v6 }
  0x29   :  { %527 = vmatmul.msk.f32.gmra.mxu2 %vm200_vm0, %v193_v7 }
  0x2a   :  { %524 = vmatmul.msk.f32.gmra.mxu1 %vm200_vm0, %v190_v8 }
  0x2b   :  { %522 = vmatmul.msk.f32.gmra.mxu3 %vm147_vm1, %v140_v9 }
  0x31   :  { %528 = vmatmul.msk.f32.gmra.mxu2 %vm200_vm0, %v194_v10 }
  0x32   :  { %525 = vmatmul.msk.f32.gmra.mxu1 %vm200_vm0, %v191_v11 }
  0x9f   :  { %v236_v13 = vpop.f32.mrf.mxu1 }
  0xa0   :  { %v237_v14 = vadd.f32 %v602_v12, %v236_v13 }
  0xa2   :  { %254 = vst [vmem:[#allocation3] sm:$0xff] %v237_v14 }
  0xa3   :  { %v174_v16 = vpop.f32.mrf.mxu0 }
  0xa4   :  { %v245_v17 = vpop.f32.mrf.mxu2  ;;  %v175_v18 = vadd.f32 %v603_v15, %v174_v16 }
  0xa5   :  { %v246_v19 = vadd.f32 %v602_v12, %v245_v17 }
  0xa6   :  { %v177_v20 = vpop.f32.mrf.mxu3  ;;  %v183_v21 = vmax.f32 %v175_v18, 0.0 }
  0xa7   :  { %257 = vst [vmem:[#allocation3 + $0x18] sm:$0xff] %v246_v19  ;;  %v178_v22 = vadd.f32 %v603_v15, %v177_v20  ;;  %v239_v23 = vpop.f32.mrf.mxu1 }
  0xa8   :  { %v240_v24 = vadd.f32 %v602_v12, %v239_v23  ;;  %186 = vst [vmem:[#allocation2] sm:$0xff] %v183_v21 }
  0xa9   :  { %v184_v25 = vmax.f32 %v178_v22, 0.0 }
  0xaa   :  { %255 = vst [vmem:[#allocation3 + $0x8] sm:$0xff] %v240_v24 }
  0xab   :  { %187 = vst [vmem:[#allocation2 + $0x8] sm:$0xff] %v184_v25 }
  0xac   :  { %v248_v26 = vpop.f32.mrf.mxu2 }
  0xad   :  { %v249_v27 = vadd.f32 %v602_v12, %v248_v26 }
  0xae   :  { %v180_v28 = vpop.f32.mrf.mxu3 }
  0xaf   :  { %258 = vst [vmem:[#allocation3 + $0x20] sm:$0xff] %v249_v27  ;;  %v181_v29 = vadd.f32 %v603_v15, %v180_v28  ;;  %v242_v30 = vpop.f32.mrf.mxu1 }
  0xb0   :  { %v243_v31 = vadd.f32 %v602_v12, %v242_v30 }
  0xb1   :  { %v185_v32 = vmax.f32 %v181_v29, 0.0 }
  0xb2   :  { %256 = vst [vmem:[#allocation3 + $0x10] sm:$0xff] %v243_v31 }
  0xb3   :  { %188 = vst [vmem:[#allocation2 + $0x10] sm:$0xff] %v185_v32 }
  0xb4   :  { %v251_v33 = vpop.f32.mrf.mxu2 }
  0xb5   :  { %v252_v34 = vadd.f32 %v602_v12, %v251_v33 }
  0xb7   :  { %259 = vst [vmem:[#allocation3 + $0x28] sm:$0xff] %v252_v34 }
  0xb8 LB: > { %v781_v35 = vmov 0.0   ;;  %s765_s7 = smov 0   ;;  %s763_s5 = sphi %s941_s5, %s265_s5  }
  0xb9   : > { %266 = vst [vmem:[#allocation4] sm:$0xff] %v781_v35 }
  0xba   : > { %267 = vst [vmem:[#allocation4 + $0x8] sm:$0xff] %v781_v35 }
  0xbb   : > { %268 = vst [vmem:[#allocation4 + $0x10] sm:$0xff] %v781_v35 }
  0xbc LB: >> { %s275_s9 = sld [smem:[#allocation7 + %s767_s7]]  ;;  %s279_s20 = scalar_lea.vmem [#allocation3], %s767_s7  ;;  %s767_s7 = sphi %s765_s7, %s274_s7  }
  0xbd   : >> { %s276_s1 = sld [smem:[#allocation11 + %s767_s7]]  ;;  %s274_s7 = sadd.s32 1, %s767_s7  }
  0xbe   : >> { %v280_v36 = vld [vmem:[%s279_s20] sm:$0x1]  ;;  %p271_p0 = scmp.ge.s32.totalorder %s274_s7, 48  }
  0xbf   : > { %s529_s23 = sshll.u32 (%p271_p0), %s763_s5, 7  ;;  %s314_s12 = scalar_lea.vmem (%p271_p0), %s1018_s11, %s763_s5  ;;  %v288_v1 = vld [vmem:[#allocation2 + $0x8] sm:$0xff] (%p271_p0)  ;;  %v287_v3 = vld [vmem:[#allocation2] sm:$0xff] (%p271_p0)  ;;  %v289_v13 = vld [vmem:[#allocation2 + $0x10] sm:$0xff] (%p271_p0) }
  0xc0   : > { %s951_s25 = scalar_lea.vmem (%p271_p0), [#allocation14], %s529_s23  ;;  %s959_s6 = scalar_lea.vmem (%p271_p0), [#allocation15], %s529_s23  ;;  %v604_v19 = vld [vmem:[%s314_s12] ss:$0 sm:$0xff] (%p271_p0) }
  0xc1   : > { %v313_v42 = vld [vmem:[%s951_s25 + $0x78] sm:$0xff] (%p271_p0)  ;;  %v312_v43 = vld [vmem:[%s951_s25 + $0x70] sm:$0xff] (%p271_p0)  ;;  %v311_v44 = vld [vmem:[%s951_s25 + $0x68] sm:$0xff] (%p271_p0)  ;;  %s365_s28 = scalar_lea.vmem (%p271_p0), %s1020_s13, %s763_s5  ;;  %p530_p1 = scmp.ge.s32.totalorder (%p271_p0), %s763_s5, 4 }
  0xc2   : >> { %s277_s21 = scalar_lea.vmem [#allocation2], %s275_s9  ;;  %535 = vmatpush.msra.mxu2 (%p271_p0), %v313_v42  ;;  %319 = vmatpush.msra.mxu0 (%p271_p0), %v313_v42  ;;  %v310_v45 = vld [vmem:[%s951_s25 + $0x60] sm:$0xff] (%p271_p0)  ;;  %v309_v46 = vld [vmem:[%s951_s25 + $0x58] sm:$0xff] (%p271_p0)  ;;  %v308_v47 = vld [vmem:[%s951_s25 + $0x50] sm:$0xff] (%p271_p0) }
  0xc3   : >> { %v278_v37 = vld [vmem:[%s277_s21] sm:$0x1]  ;;  %s283_s22 = scalar_lea.vmem [#allocation4], %s276_s1  ;;  %v364_v48 = vld [vmem:[%s959_s6 + $0x78] sm:$0xff] (%p271_p0)  ;;  %v363_v49 = vld [vmem:[%s959_s6 + $0x70] sm:$0xff] (%p271_p0) }
  0xc4   : >> { %v281_v38 = vadd.f32 %v280_v36, %v278_v37  ;;  %v284_v39 = vld [vmem:[%s283_s22] sm:$0x1]  ;;  %536 = vmatpush.msra.mxu2 (%p271_p0), %v312_v43  ;;  %320 = vmatpush.msra.mxu0 (%p271_p0), %v312_v43  ;;  %v307_v50 = vld [vmem:[%s951_s25 + $0x48] sm:$0xff] (%p271_p0)  ;;  %v305_v54 = vld [vmem:[%s951_s25 + $0x38] sm:$0xff] (%p271_p0) }
  0xc5   : > { %551 = vmatpush.msra.mxu3 (%p271_p0), %v364_v48  ;;  %370 = vmatpush.msra.mxu1 (%p271_p0), %v364_v48  ;;  %v362_v51 = vld [vmem:[%s959_s6 + $0x68] sm:$0xff] (%p271_p0)  ;;  %v306_v52 = vld [vmem:[%s951_s25 + $0x40] sm:$0xff] (%p271_p0)  ;;  %v360_v55 = vld [vmem:[%s959_s6 + $0x58] sm:$0xff] (%p271_p0) }
  0xc6   : >> { %v282_v40 = vmax.f32 %v281_v38, 0.0  ;;  %273 = sbr.rel (!%p271_p0) target bundleno = 188 (0xbc), region = 146  ;;  %537 = vmatpush.msra.mxu2 (%p271_p0), %v311_v44  ;;  %321 = vmatpush.msra.mxu0 (%p271_p0), %v311_v44  ;;  %v361_v53 = vld [vmem:[%s959_s6 + $0x60] sm:$0xff] (%p271_p0)  ;;  %v304_v56 = vld [vmem:[%s951_s25 + $0x30] sm:$0xff] (%p271_p0)  ;;  %v303_v58 = vld [vmem:[%s951_s25 + $0x28] sm:$0xff] (%p271_p0) }
  0xc7   : > { %552 = vmatpush.msra.mxu3 (%p271_p0), %v363_v49  ;;  %371 = vmatpush.msra.mxu1 (%p271_p0), %v363_v49  ;;  %v359_v57 = vld [vmem:[%s959_s6 + $0x50] sm:$0xff] (%p271_p0)  ;;  %v358_v59 = vld [vmem:[%s959_s6 + $0x48] sm:$0xff] (%p271_p0)  ;;  %v302_v60 = vld [vmem:[%s951_s25 + $0x20] sm:$0xff] (%p271_p0) }
  0xc8   : >> { %v285_v41 = vadd.f32 %v284_v39, %v282_v40  ;;  %538 = vmatpush.msra.mxu2 (%p271_p0), %v310_v45  ;;  %322 = vmatpush.msra.mxu0 (%p271_p0), %v310_v45  ;;  %v357_v61 = vld [vmem:[%s959_s6 + $0x40] sm:$0xff] (%p271_p0)  ;;  %v301_v62 = vld [vmem:[%s951_s25 + $0x18] sm:$0xff] (%p271_p0)  ;;  %v300_v0 = vld [vmem:[%s951_s25 + $0x10] sm:$0xff] (%p271_p0) }
  0xc9   : > { %553 = vmatpush.msra.mxu3 (%p271_p0), %v362_v51  ;;  %372 = vmatpush.msra.mxu1 (%p271_p0), %v362_v51  ;;  %v356_v63 = vld [vmem:[%s959_s6 + $0x38] sm:$0xff] (%p271_p0)  ;;  %v355_v5 = vld [vmem:[%s959_s6 + $0x30] sm:$0xff] (%p271_p0)  ;;  %v299_v6 = vld [vmem:[%s951_s25 + $0x8] sm:$0xff] (%p271_p0) }
  0xca   : >> { %286 = vst [vmem:[%s283_s22] sm:$0x1] %v285_v41  ;;  %539 = vmatpush.msra.mxu2 (%p271_p0), %v309_v46  ;;  %323 = vmatpush.msra.mxu0 (%p271_p0), %v309_v46  ;;  %v354_v7 = vld [vmem:[%s959_s6 + $0x28] sm:$0xff] (%p271_p0)  ;;  %v298_v8 = vld [vmem:[%s951_s25] sm:$0xff] (%p271_p0)  ;;  %v352_v12 = vld [vmem:[%s959_s6 + $0x18] sm:$0xff] (%p271_p0) }
  0xcb   : > { %554 = vmatpush.msra.mxu3 %v361_v53  ;;  %373 = vmatpush.msra.mxu1 %v361_v53  ;;  %v353_v11 = vld [vmem:[%s959_s6 + $0x20] sm:$0xff]  ;;  %v351_v16 = vld [vmem:[%s959_s6 + $0x10] sm:$0xff]  ;;  %v350_v17 = vld [vmem:[%s959_s6 + $0x8] sm:$0xff] }
  0xcc   : > { %540 = vmatpush.msra.mxu2 %v308_v47  ;;  %324 = vmatpush.msra.mxu0 %v308_v47  ;;  %v349_v18 = vld [vmem:[%s959_s6] sm:$0xff] }
  0xcd   : > { %555 = vmatpush.msra.mxu3 %v360_v55  ;;  %374 = vmatpush.msra.mxu1 %v360_v55  ;;  %v605_v29 = vld [vmem:[%s365_s28] ss:$0 sm:$0xff] }
  0xce   : > { %541 = vmatpush.msra.mxu2 %v307_v50  ;;  %325 = vmatpush.msra.mxu0 %v307_v50 }
  0xcf   : > { %556 = vmatpush.msra.mxu3 %v359_v57  ;;  %375 = vmatpush.msra.mxu1 %v359_v57 }
  0xd0   : > { %542 = vmatpush.msra.mxu2 %v306_v52  ;;  %326 = vmatpush.msra.mxu0 %v306_v52 }
  0xd1   : > { %557 = vmatpush.msra.mxu3 %v358_v59  ;;  %376 = vmatpush.msra.mxu1 %v358_v59  ;;  %v291_v2 = vld [vmem:[#allocation4 + $0x8] sm:$0xff]  ;;  %v290_v4 = vld [vmem:[#allocation4] sm:$0xff]  ;;  %v292_v14 = vld [vmem:[#allocation4 + $0x10] sm:$0xff] }
  0xd2   : > { %543 = vmatpush.msra.mxu2 %v305_v54  ;;  %327 = vmatpush.msra.mxu0 %v305_v54  ;;  %v294_v9 = vadd.f32 %v291_v2, %v288_v1  ;;  %v293_v10 = vadd.f32 %v290_v4, %v287_v3  ;;  %v295_v15 = vadd.f32 %v292_v14, %v289_v13 }
  0xd3   : > { %558 = vmatpush.msra.mxu3 %v357_v61  ;;  %377 = vmatpush.msra.mxu1 %v357_v61 }
  0xd4   : > { %544 = vmatpush.msra.mxu2 %v304_v56  ;;  %328 = vmatpush.msra.mxu0 %v304_v56 }
  0xd5   : > { %559 = vmatpush.msra.mxu3 %v356_v63  ;;  %378 = vmatpush.msra.mxu1 %v356_v63 }
  0xd6   : > { %545 = vmatpush.msra.mxu2 %v303_v58  ;;  %329 = vmatpush.msra.mxu0 %v303_v58 }
  0xd7   : > { %560 = vmatpush.msra.mxu3 %v355_v5  ;;  %379 = vmatpush.msra.mxu1 %v355_v5 }
  0xd8   : > { %546 = vmatpush.msra.mxu2 %v302_v60  ;;  %330 = vmatpush.msra.mxu0 %v302_v60 }
  0xd9   : > { %561 = vmatpush.msra.mxu3 %v354_v7  ;;  %380 = vmatpush.msra.mxu1 %v354_v7 }
  0xda   : > { %547 = vmatpush.msra.mxu2 %v301_v62  ;;  %331 = vmatpush.msra.mxu0 %v301_v62 }
  0xdb   : > { %562 = vmatpush.msra.mxu3 %v353_v11  ;;  %381 = vmatpush.msra.mxu1 %v353_v11 }
  0xdc   : > { %548 = vmatpush.msra.mxu2 %v300_v0  ;;  %332 = vmatpush.msra.mxu0 %v300_v0 }
  0xdd   : > { %563 = vmatpush.msra.mxu3 %v352_v12  ;;  %382 = vmatpush.msra.mxu1 %v352_v12 }
  0xde   : > { %549 = vmatpush.msra.mxu2 %v299_v6  ;;  %333 = vmatpush.msra.mxu0 %v299_v6 }
  0xdf   : > { %564 = vmatpush.msra.mxu3 %v351_v16  ;;  %383 = vmatpush.msra.mxu1 %v351_v16 }
  0xe0   : > { %550 = vmatpush.msra.mxu2 %v298_v8  ;;  %334 = vmatpush.msra.mxu0 %v298_v8 }
  0xe1   : > { %338 = vmatmul.f32.vlgmr.msra.gmra.mxu2 %v294_v9  ;;  %335 = vmatmul.f32.vlgmr.msra.gmra.mxu0 %v293_v10 }
  0xe2   : > { %565 = vmatpush.msra.mxu3 %v350_v17  ;;  %384 = vmatpush.msra.mxu1 %v350_v17 }
  0xe4   : > { %566 = vmatpush.msra.mxu3 %v349_v18  ;;  %385 = vmatpush.msra.mxu1 %v349_v18 }
  0xe9   : > { %341 = vmatmul.f32.gmra.mxu2 %v295_v15 }
 0x15e   : > { %v336_v20 = vpop.f32.mrf.mxu0 }
 0x15f   : > { %v337_v21 = vadd.f32 %v604_v19, %v336_v20 }
 0x161   : > { %v345_v22 = vmax.f32 %v337_v21, 0.0 }
 0x163   : > { %386 = vmatmul.f32.vlgmr.msra.gmra.mxu1 %v345_v22 }
 0x164   : > { %v339_v23 = vpop.f32.mrf.mxu2 }
 0x165   : > { %v340_v24 = vadd.f32 %v604_v19, %v339_v23 }
 0x167   : > { %v346_v25 = vmax.f32 %v340_v24, 0.0 }
 0x169   : > { %389 = vmatmul.f32.vlgmr.msra.gmra.mxu3 %v346_v25 }
 0x16c   : > { %v342_v26 = vpop.f32.mrf.mxu2 }
 0x16d   : > { %v343_v27 = vadd.f32 %v604_v19, %v342_v26 }
 0x16f   : > { %v347_v28 = vmax.f32 %v343_v27, 0.0 }
 0x171   : > { %392 = vmatmul.f32.gmra.mxu3 %v347_v28 }
 0x1e0   : > { %v387_v30 = vpop.f32.mrf.mxu1 }
 0x1e1   : > { %v388_v31 = vadd.f32 %v605_v29, %v387_v30 }
 0x1ec   : > { %v390_v32 = vpop.f32.mrf.mxu3 }
 0x1ed   : > { %v391_v33 = vadd.f32 %v605_v29, %v390_v32 }
 0x1f1   : > { %399 = sbr.rel (%p530_p1) target bundleno = 507 (0x1fb), region = 107 }
 0x1f4   : > { %v393_v34 = vpop.f32.mrf.mxu3 }
 0x1f5   : > { %v394_v35 = vadd.f32 %v605_v29, %v393_v34 }
 0x1f6   : > { %v400_v36 = vmax.f32 %v388_v31, 0.0  ;;  %v401_v37 = vmax.f32 %v391_v33, 0.0 }
 0x1f7   : > { %v402_v38 = vmax.f32 %v394_v35, 0.0 }
 0x1f8   : > { %403 = vst [vmem:[#allocation2] sm:$0xff] %v400_v36 }
 0x1f9   : > { %404 = vst [vmem:[#allocation2 + $0x8] sm:$0xff] %v401_v37 }
 0x1fa   : > { %405 = vst [vmem:[#allocation2 + $0x10] sm:$0xff] %v402_v38 }
 0x1fb PF: > { %p531_p2 = scmp.ne.s32.totalorder %s763_s5, 4 }
 0x1fd   : > { %409 = sbr.rel (%p531_p2) target bundleno = 517 (0x205), region = 111 }
 0x202   : > { %410 = vst [vmem:[#allocation2] sm:$0xff] %v388_v31 }
 0x203   : > { %411 = vst [vmem:[#allocation2 + $0x8] sm:$0xff] %v391_v33 }
 0x204   : > { %412 = vst [vmem:[#allocation2 + $0x10] sm:$0xff] %v394_v35 }
 0x205 PF: > { %s265_s5 = sadd.s32 1, %s763_s5  }
 0x206   : > { %p262_p3 = scmp.ge.s32.totalorder %s265_s5, 5  }
 0x207   :  { %v782_v39 = vmov (%p262_p3), 0.0   ;;  %s769_s17 = smov (%p262_p3), 0  }
 0x208   :  { %264 = sbr.rel (!%p262_p3) target bundleno = 184 (0xb8), region = 157  ;;  %413 = vst [vmem:[#allocation5] sm:$0x3] (%p262_p3), %v782_v39 }
 0x20d LB: > { %s420_s29 = sld [smem:[#allocation13 + %s771_s17]]  ;;  %s423_s2 = scalar_lea.vmem [#allocation2], %s771_s17  ;;  %s771_s17 = sphi %s769_s17, %s419_s17  }
 0x20e   : > { %v424_v40 = vld [vmem:[%s423_s2] sm:$0x1]  ;;  %s419_s17 = sadd.s32 1, %s771_s17  }
 0x20f   : > { %p416_p4 = scmp.ge.s32.totalorder %s419_s17, 24  }
 0x210   :  { %v443_v43 = vld [vmem:[#allocation17 + $0x78] sm:$0xff] (%p416_p4)  ;;  %v442_v44 = vld [vmem:[#allocation17 + $0x70] sm:$0xff] (%p416_p4)  ;;  %v441_v45 = vld [vmem:[#allocation17 + $0x68] sm:$0xff] (%p416_p4)  ;;  %s468_s11 = sld [smem:[#allocation6]] (%p416_p4)  ;;  %s783_s18 = smov (%p416_p4), [#allocation18]  }
 0x211   :  { %448 = vmatpush.msra.mxu0 (%p416_p4), %v443_v43  ;;  %v440_v46 = vld [vmem:[#allocation17 + $0x60] sm:$0xff] (%p416_p4)  ;;  %v439_v47 = vld [vmem:[#allocation17 + $0x58] sm:$0xff] (%p416_p4)  ;;  %v438_v48 = vld [vmem:[#allocation17 + $0x50] sm:$0xff] (%p416_p4)  ;;  %s479_s4 = sshll.u32 (%p416_p4), %s783_s18, 4  ;;  %s481_s5 = sshll.u32 (%p416_p4), %s1023_s16, 4  ;;  %s480_s4 = int_to_ptr.vmem [resolvable:$true] %s479_s4  ;;  %s482_s5 = int_to_ptr.hbm [resolvable:$true] %s481_s5 }
 0x212   :  { %v437_v49 = vld [vmem:[#allocation17 + $0x48] sm:$0xff] (%p416_p4)  ;;  %v436_v50 = vld [vmem:[#allocation17 + $0x40] sm:$0xff] (%p416_p4)  ;;  %v435_v51 = vld [vmem:[#allocation17 + $0x38] sm:$0xff] (%p416_p4) }
 0x213   : > { %s421_s0 = scalar_lea.vmem [#allocation5], %s420_s29  ;;  %418 = sbr.rel (!%p416_p4) target bundleno = 525 (0x20d), region = 168  ;;  %449 = vmatpush.msra.mxu0 (%p416_p4), %v442_v44  ;;  %v434_v52 = vld [vmem:[#allocation17 + $0x30] sm:$0xff] (%p416_p4)  ;;  %v433_v53 = vld [vmem:[#allocation17 + $0x28] sm:$0xff] (%p416_p4)  ;;  %v432_v54 = vld [vmem:[#allocation17 + $0x20] sm:$0xff] (%p416_p4) }
 0x214   : > { %v422_v41 = vld [vmem:[%s421_s0] sm:$0x1]  ;;  %v430_v56 = vld [vmem:[#allocation17 + $0x10] sm:$0xff] (%p416_p4)  ;;  %v429_v57 = vld [vmem:[#allocation17 + $0x8] sm:$0xff] (%p416_p4) }
 0x215   : > { %v425_v42 = vadd.f32 %v424_v40, %v422_v41  ;;  %450 = vmatpush.msra.mxu0 (%p416_p4), %v441_v45  ;;  %v431_v55 = vld [vmem:[#allocation17 + $0x18] sm:$0xff] (%p416_p4)  ;;  %v428_v58 = vld [vmem:[#allocation17] sm:$0xff] (%p416_p4) }
 0x216   :  { %v606_v60 = vld [vmem:[%s1022_s15] ss:$0 sm:$0xff] (%p416_p4)  ;;  %v470_v62 = vstv (%p416_p4), %s468_s11 }
 0x217   : > { %426 = vst [vmem:[%s421_s0] sm:$0x1] %v425_v42  ;;  %451 = vmatpush.msra.mxu0 (%p416_p4), %v440_v46 }
 0x219   :  { %452 = vmatpush.msra.mxu0 %v439_v47 }
 0x21b   :  { %453 = vmatpush.msra.mxu0 %v438_v48 }
 0x21d   :  { %454 = vmatpush.msra.mxu0 %v437_v49 }
 0x21e   :  { %v427_v59 = vld [vmem:[#allocation5] sm:$0x3] }
 0x21f   :  { %455 = vmatpush.msra.mxu0 %v436_v50 }
 0x221   :  { %456 = vmatpush.msra.mxu0 %v435_v51 }
 0x223   :  { %457 = vmatpush.msra.mxu0 %v434_v52 }
 0x225   :  { %458 = vmatpush.msra.mxu0 %v433_v53 }
 0x227   :  { %459 = vmatpush.msra.mxu0 %v432_v54 }
 0x229   :  { %460 = vmatpush.msra.mxu0 %v431_v55 }
 0x22b   :  { %461 = vmatpush.msra.mxu0 %v430_v56 }
 0x22d   :  { %462 = vmatpush.msra.mxu0 %v429_v57 }
 0x22f   :  { %463 = vmatpush.msra.mxu0 %v428_v58 }
 0x230   :  { %464 = vmatmul.f32.vlgmr.msra.gmra.mxu0 %v427_v59 }
 0x2ad   :  { %v465_v61 = vpop.f32.mrf.mxu0 }
 0x2ae   :  { %v466_v63 = vadd.f32 %v606_v60, %v465_v61 }
 0x2b0   :  { %v471_v0 = vmul.f32 %v470_v62, %v466_v63  ;;  %vm469_vm2 = vcmp.gt.f32.partialorder %v466_v63, 0.0 }
 0x2b2   :  { %v472_v1 = vsel %vm469_vm2, %v466_v63, %v471_v0 }
 0x2b3   :  { %473 = vst [vmem:[#allocation18] sm:$0x3] %v472_v1 }
 0x2b4   :  { %484 = dma.vmem_to_hbm [thread:$0]  %s480_s4, 32, %s482_s5, [#allocation9]  }
 0x2b5   :  { %759 = dma.done.wait [#allocation9], 32  }
 0x2b6   :  { %760 = vsyncadd [#allocation9], 4294967264 }
 0x2b7   :  { %489 = vsyncpa [#allocation8], 1 }
 0x2b8   :  { %490 = vsyncpa [#allocation16], 1 }
 0x2b9   :  { %491 = vsyncpa [#allocation9], 1 }
 0x2ba   :  { %492 = vsyncpa [#allocation10], 1 }
 0x2bb   :  { %493 = vsyncpa [#allocation12], 1 }

</bundles_post_ra>
